<compile_context>
chip_gen: v7x
topology: tpu7x:2x2x1
jax: 0.10.0
libtpu: 0.0.40
codegen_flags: <defaults>
</compile_context>

<pallas_src>
import jax
import jax.numpy as jnp
from jax.experimental import pallas as pl
from jax.experimental.pallas import tpu as pltpu

_LANES = 128
_SUBLANES = 8


def _round_up(x, m):
    return ((x + m - 1) // m) * m


def _lane_pad(n):
    # Minor-dim footprint of a block in VMEM: lanes pad up to a multiple of 128.
    return max(_LANES, _round_up(n, _LANES))


def _qnetwork_kernel(x_ref, w1_ref, b1_ref, w2_ref, b2_ref, w3_ref, b3_ref,
                     out_ref):
    """Fused Linear->ReLU->Linear->ReLU->Linear for one (tile_b, S) batch tile.

    All math is f32 with f32 MXU accumulation.  The input cast is a no-op when
    the state is already f32 and transparently supports a bf16 HBM-side state.
    """
    x = x_ref[...].astype(jnp.float32)

    h1 = jnp.dot(x, w1_ref[...], preferred_element_type=jnp.float32)
    h1 = jnp.maximum(h1 + b1_ref[...], 0.0)                 # (tile_b,H)+(1,H)

    h2 = jnp.dot(h1, w2_ref[...], preferred_element_type=jnp.float32)
    h2 = jnp.maximum(h2 + b2_ref[...], 0.0)

    y = jnp.dot(h2, w3_ref[...], preferred_element_type=jnp.float32)
    out_ref[...] = (y + b3_ref[...]).astype(out_ref.dtype)   # (tile_b, A) store


def qnetwork_forward(state, params, *, tile_b=4096, out_dtype=jnp.float32,
                     vmem_budget_bytes=20 << 20):
    """Run the fused Q-network MLP Pallas kernel.

    state:  (B, state_size) f32 (or bf16) array
    params: dict with w1 (S,H), b1 (1,H), w2 (H,H), b2 (1,H), w3 (H,A), b3 (1,A)
    returns (B, action_size) `out_dtype` action values
    """
    B, S = state.shape
    H = params["w1"].shape[1]
    A = params["w3"].shape[1]
    in_bytes = jnp.dtype(state.dtype).itemsize
    out_bytes = jnp.dtype(out_dtype).itemsize

    # ---- batch-tile selection --------------------------------------------
    # Real per-row VMEM footprint: every block's minor dim is lane-padded to a
    # multiple of 128 in VMEM, so the narrow (tile_b,S)/(tile_b,A) blocks each
    # occupy a full 128-lane row; in/out tiles are double-buffered, h1/h2/y are
    # f32 intermediates.  (~3.5 KiB/row at S=8, H=64, A=4.)
    bytes_per_row = (2 * _lane_pad(S) * in_bytes       # input, double-buffered
                     + 2 * _lane_pad(A) * out_bytes    # output, double-buffered
                     + 2 * _lane_pad(H) * 4            # h1, h2
                     + _lane_pad(A) * 4)               # y before the store
    max_tile_vmem = max(
        _SUBLANES,
        (vmem_budget_bytes // bytes_per_row) // _SUBLANES * _SUBLANES)

    # Keep >= 2 grid steps whenever the batch allows it so the "parallel" batch
    # axis actually feeds both v7x TensorCores (no measured cost on v5e/v6e).
    max_tile_two_steps = max(_SUBLANES, _round_up(pl.cdiv(B, 2), _SUBLANES))

    tile_b = min(tile_b, max_tile_vmem, max_tile_two_steps)
    tile_b = max(_SUBLANES, (tile_b // _SUBLANES) * _SUBLANES)  # sublane align

    B_pad = _round_up(B, tile_b)
    if B_pad != B:
        state = jnp.pad(state, ((0, B_pad - B), (0, 0)))
    grid = (B_pad // tile_b,)

    resident = lambda i: (0, 0)   # weights/biases: same block every grid step

    # Explicit scoped-VMEM limit: real footprint + headroom, clamped well below
    # v7x's 64 MiB physical VMEM (v5e/v6e have 128 MiB physical).
    vmem_limit = int(min(max(tile_b * bytes_per_row * 2 + (2 << 20), 16 << 20),
                         48 << 20))

    out = pl.pallas_call(
        _qnetwork_kernel,
        out_shape=jax.ShapeDtypeStruct((B_pad, A), out_dtype),
        grid=grid,
        in_specs=[
            pl.BlockSpec((tile_b, S), lambda i: (i, 0)),   # batch-tiled input
            pl.BlockSpec((S, H), resident),
            pl.BlockSpec((1, H), resident),
            pl.BlockSpec((H, H), resident),
            pl.BlockSpec((1, H), resident),
            pl.BlockSpec((H, A), resident),
            pl.BlockSpec((1, A), resident),
        ],
        out_specs=pl.BlockSpec((tile_b, A), lambda i: (i, 0)),
        compiler_params=pltpu.CompilerParams(
            dimension_semantics=("parallel",),   # shards batch tiles on v7x
            vmem_limit_bytes=vmem_limit),
    )(state, params["w1"], params["b1"], params["w2"], params["b2"],
      params["w3"], params["b3"])

    return out if B_pad == B else out[:B]


def init_qnetwork_params(state_size, action_size, seed=0, hidden_size=64):
    """Deterministic init mimicking PyTorch nn.Linear default:
    W, b ~ U(-1/sqrt(fan_in), 1/sqrt(fan_in)). Weights stored (in, out)."""
    key = jax.random.PRNGKey(seed)
    ks = jax.random.split(key, 6)

    def uniform(k, shape, fan_in):
        bound = 1.0 / jnp.sqrt(jnp.float32(fan_in))
        return jax.random.uniform(k, shape, jnp.float32, -bound, bound)

    return {
        "w1": uniform(ks[0], (state_size, hidden_size), state_size),
        "b1": uniform(ks[1], (1, hidden_size), state_size),
        "w2": uniform(ks[2], (hidden_size, hidden_size), hidden_size),
        "b2": uniform(ks[3], (1, hidden_size), hidden_size),
        "w3": uniform(ks[4], (hidden_size, action_size), hidden_size),
        "b3": uniform(ks[5], (1, action_size), hidden_size),
    }


def qnetwork_ref(state, params):
    """Pure-JAX reference for correctness check."""
    h1 = jnp.maximum(state @ params["w1"] + params["b1"], 0.0)
    h2 = jnp.maximum(h1 @ params["w2"] + params["b2"], 0.0)
    return h2 @ params["w3"] + params["b3"]


# TODO(synk): QNetwork.loss (MSE) is not part of forward() and is omitted here.

if __name__ == "__main__":
    batch = 8
    state_size = 8      # e.g. LunarLander-style small state dim
    action_size = 4

    key = jax.random.PRNGKey(0)
    k_state, k_big = jax.random.split(key)
    state = jax.random.normal(k_state, (batch, state_size), dtype=jnp.float32)

    params = init_qnetwork_params(state_size, action_size, seed=0)
    ref = qnetwork_ref(state, params)

    # 1) f32 path, single small tile (tile_b clamps to the batch).
    out = jax.block_until_ready(qnetwork_forward(state, params))
    assert out.shape == (batch, action_size)
    assert jnp.allclose(out, ref, atol=1e-5, rtol=1e-5)

    # 2) Multi-tile grid + batch padding path (B=300 not a multiple of tile_b).
    big_state = jax.random.normal(k_big, (300, state_size), dtype=jnp.float32)
    out_big = jax.block_until_ready(
        qnetwork_forward(big_state, params, tile_b=128))
    assert jnp.allclose(out_big, qnetwork_ref(big_state, params),
                        atol=1e-5, rtol=1e-5)

    # 3) bf16 at the HBM boundary (bf16 state, f32 math inside the kernel).
    out_bf16 = jax.block_until_ready(
        qnetwork_forward(state.astype(jnp.bfloat16), params))
    assert jnp.allclose(out_bf16, ref, atol=1e-2, rtol=1e-2)

    print("KERNEL_OK")
</pallas_src>

<mosaic_0001>
module attributes {stable_mosaic.version = 11 : i64} {
  func.func @_qnetwork_kernel(%arg0: i32, %arg1: memref<8x8xf32, #tpu.memory_space<vmem>>, %arg2: memref<8x64xf32, #tpu.memory_space<vmem>>, %arg3: memref<1x64xf32, #tpu.memory_space<vmem>>, %arg4: memref<64x64xf32, #tpu.memory_space<vmem>>, %arg5: memref<1x64xf32, #tpu.memory_space<vmem>>, %arg6: memref<64x4xf32, #tpu.memory_space<vmem>>, %arg7: memref<1x4xf32, #tpu.memory_space<vmem>>, %arg8: memref<8x4xf32, #tpu.memory_space<vmem>>) attributes {dimension_semantics = [#tpu.dimension_semantics<parallel>], iteration_bounds = array<i64: 1>, scalar_prefetch = 0 : i64, scratch_operands = 0 : i64, tpu.core_type = #tpu.core_type<tc>, window_params = [{transform_indices = @transform_0, window_bounds = array<i64: 8, 8>}, {pipeline_mode = #tpu.pipeline_mode<synchronous>, transform_indices = @transform_1, window_bounds = array<i64: 8, 64>}, {pipeline_mode = #tpu.pipeline_mode<synchronous>, transform_indices = @transform_2, window_bounds = array<i64: 1, 64>}, {pipeline_mode = #tpu.pipeline_mode<synchronous>, transform_indices = @transform_3, window_bounds = array<i64: 64, 64>}, {pipeline_mode = #tpu.pipeline_mode<synchronous>, transform_indices = @transform_4, window_bounds = array<i64: 1, 64>}, {pipeline_mode = #tpu.pipeline_mode<synchronous>, transform_indices = @transform_5, window_bounds = array<i64: 64, 4>}, {pipeline_mode = #tpu.pipeline_mode<synchronous>, transform_indices = @transform_6, window_bounds = array<i64: 1, 4>}, {transform_indices = @transform_7, window_bounds = array<i64: 8, 4>}]} {
    %c0 = arith.constant 0 : index
    %c0_0 = arith.constant 0 : index
    %0 = vector.load %arg1[%c0, %c0_0] : memref<8x8xf32, #tpu.memory_space<vmem>>, vector<8x8xf32>
    %c0_1 = arith.constant 0 : index
    %c0_2 = arith.constant 0 : index
    %1 = vector.load %arg2[%c0_1, %c0_2] : memref<8x64xf32, #tpu.memory_space<vmem>>, vector<8x64xf32>
    %cst = arith.constant dense<0.000000e+00> : vector<8x64xf32>
    %2 = tpu.matmul %0, %1, %cst {dimension_numbers = #tpu.dot_dimension_numbers<[1], [0], [0], [1], [0, 0, 1, 1], [], []>} : vector<8x8xf32>, vector<8x64xf32>, vector<8x64xf32> -> vector<8x64xf32>
    %c0_3 = arith.constant 0 : index
    %c0_4 = arith.constant 0 : index
    %3 = vector.load %arg3[%c0_3, %c0_4] : memref<1x64xf32, #tpu.memory_space<vmem>>, vector<1x64xf32>
    %4 = vector.broadcast %3 : vector<1x64xf32> to vector<8x64xf32>
    %5 = arith.addf %2, %4 : vector<8x64xf32>
    %cst_5 = arith.constant 0.000000e+00 : f32
    %6 = vector.broadcast %cst_5 : f32 to vector<8x64xf32>
    %7 = arith.maximumf %5, %6 : vector<8x64xf32>
    %c0_6 = arith.constant 0 : index
    %c0_7 = arith.constant 0 : index
    %8 = vector.load %arg4[%c0_6, %c0_7] : memref<64x64xf32, #tpu.memory_space<vmem>>, vector<64x64xf32>
    %cst_8 = arith.constant dense<0.000000e+00> : vector<8x64xf32>
    %9 = tpu.matmul %7, %8, %cst_8 {dimension_numbers = #tpu.dot_dimension_numbers<[1], [0], [0], [1], [0, 0, 1, 1], [], []>} : vector<8x64xf32>, vector<64x64xf32>, vector<8x64xf32> -> vector<8x64xf32>
    %c0_9 = arith.constant 0 : index
    %c0_10 = arith.constant 0 : index
    %10 = vector.load %arg5[%c0_9, %c0_10] : memref<1x64xf32, #tpu.memory_space<vmem>>, vector<1x64xf32>
    %11 = vector.broadcast %10 : vector<1x64xf32> to vector<8x64xf32>
    %12 = arith.addf %9, %11 : vector<8x64xf32>
    %cst_11 = arith.constant 0.000000e+00 : f32
    %13 = vector.broadcast %cst_11 : f32 to vector<8x64xf32>
    %14 = arith.maximumf %12, %13 : vector<8x64xf32>
    %c0_12 = arith.constant 0 : index
    %c0_13 = arith.constant 0 : index
    %15 = vector.load %arg6[%c0_12, %c0_13] : memref<64x4xf32, #tpu.memory_space<vmem>>, vector<64x4xf32>
    %cst_14 = arith.constant dense<0.000000e+00> : vector<8x4xf32>
    %16 = tpu.matmul %14, %15, %cst_14 {dimension_numbers = #tpu.dot_dimension_numbers<[1], [0], [0], [1], [0, 0, 1, 1], [], []>} : vector<8x64xf32>, vector<64x4xf32>, vector<8x4xf32> -> vector<8x4xf32>
    %c0_15 = arith.constant 0 : index
    %c0_16 = arith.constant 0 : index
    %17 = vector.load %arg7[%c0_15, %c0_16] : memref<1x4xf32, #tpu.memory_space<vmem>>, vector<1x4xf32>
    %18 = vector.broadcast %17 : vector<1x4xf32> to vector<8x4xf32>
    %19 = arith.addf %16, %18 : vector<8x4xf32>
    %c0_17 = arith.constant 0 : index
    %c0_18 = arith.constant 0 : index
    %20 = vector.load %arg8[%c0_17, %c0_18] : memref<8x4xf32, #tpu.memory_space<vmem>>, vector<8x4xf32>
    tpu.vector_store %arg8[%c0_17, %c0_18], %19 {strides = array<i32>} : memref<8x4xf32, #tpu.memory_space<vmem>>, vector<8x4xf32>,
    return
  }
  func.func @transform_0(%arg0: i32) -> (i32, i32) {
    %c0_i32 = arith.constant 0 : i32
    %c0_i32_0 = arith.constant 0 : i32
    return %arg0, %c0_i32 : i32, i32
  }
  func.func @transform_1(%arg0: i32) -> (i32, i32) {
    %c0_i32 = arith.constant 0 : i32
    %c0_i32_0 = arith.constant 0 : i32
    %c0_i32_1 = arith.constant 0 : i32
    return %c0_i32, %c0_i32_0 : i32, i32
  }
  func.func @transform_2(%arg0: i32) -> (i32, i32) {
    %c0_i32 = arith.constant 0 : i32
    %c0_i32_0 = arith.constant 0 : i32
    %c0_i32_1 = arith.constant 0 : i32
    return %c0_i32, %c0_i32_0 : i32, i32
  }
  func.func @transform_3(%arg0: i32) -> (i32, i32) {
    %c0_i32 = arith.constant 0 : i32
    %c0_i32_0 = arith.constant 0 : i32
    %c0_i32_1 = arith.constant 0 : i32
    return %c0_i32, %c0_i32_0 : i32, i32
  }
  func.func @transform_4(%arg0: i32) -> (i32, i32) {
    %c0_i32 = arith.constant 0 : i32
    %c0_i32_0 = arith.constant 0 : i32
    %c0_i32_1 = arith.constant 0 : i32
    return %c0_i32, %c0_i32_0 : i32, i32
  }
  func.func @transform_5(%arg0: i32) -> (i32, i32) {
    %c0_i32 = arith.constant 0 : i32
    %c0_i32_0 = arith.constant 0 : i32
    %c0_i32_1 = arith.constant 0 : i32
    return %c0_i32, %c0_i32_0 : i32, i32
  }
  func.func @transform_6(%arg0: i32) -> (i32, i32) {
    %c0_i32 = arith.constant 0 : i32
    %c0_i32_0 = arith.constant 0 : i32
    %c0_i32_1 = arith.constant 0 : i32
    return %c0_i32, %c0_i32_0 : i32, i32
  }
  func.func @transform_7(%arg0: i32) -> (i32, i32) {
    %c0_i32 = arith.constant 0 : i32
    %c0_i32_0 = arith.constant 0 : i32
    return %arg0, %c0_i32 : i32, i32
  }
}

</mosaic_0001>

<bundles_post_ra>
// kernel: tpu_custom_call.1
= control target key start
LH: loop header
LB: loop body
LE: loop exit
PB: predicated region body
PF: predicated region fallthrough
CT: control target
= control target key end

     0   :  { %12 = vsyncpa [#allocation3], 0  ;;  %s428_s24 = smov [#allocation2]   ;;  %s550_s0 = inlined_call_operand.vmem [shape: f32[8,8], index: 0, kind: input, shape index: {}]   ;;  %s551_s1 = inlined_call_operand.hbm [shape: f32[8,64], index: 1, kind: input, shape index: {}]   ;;  %s552_s2 = inlined_call_operand.vmem [shape: f32[1,64], index: 2, kind: input, shape index: {}]   ;;  %s553_s3 = inlined_call_operand.vmem [shape: f32[64,64], index: 3, kind: input, shape index: {}]   ;;  %s554_s4 = inlined_call_operand.vmem [shape: f32[1,64], index: 4, kind: input, shape index: {}]   ;;  %s555_s5 = inlined_call_operand.vmem [shape: f32[64,4], index: 5, kind: input, shape index: {}]   ;;  %s556_s6 = inlined_call_operand.vmem [shape: f32[1,4], index: 6, kind: input, shape index: {}]   ;;  %s557_s7 = inlined_call_operand.vmem [shape: f32[8,4], index: 7, kind: output, shape index: {}]  }
   0x1   :  { %s21_s25 = sshll.u32 %s428_s24, 4  ;;  %s404_s28 = scalar_lea.hbm %s551_s1, 128  ;;  %s22_s25 = int_to_ptr.vmem [resolvable:$true] %s21_s25 }
   0x2   :  { %p405_p0 = scmp.ne.s32.totalorder %s551_s1, %s404_s28  ;;  %p408_p1 = scmp.lt.u32.totalorder %s404_s28, %s551_s1 }
   0x4   :  { %p410_p2 = pnand %p408_p1, %p405_p0 }
   0x6   :  { %413 = shalt.err (!%p410_p2)
}
   0x7   :  { %s414_s10 = scalar_lea.vmem %s22_s25, 128  ;;  %p419_p4 = scmp.lt.s32.totalorder %s22_s25, %s22_s25 }
   0x8   :  { %p415_p3 = scmp.ne.s32.totalorder %s22_s25, %s414_s10  ;;  %p420_p5 = scmp.lt.s32.totalorder %s414_s10, %s414_s10 }
   0xa   :  { %p421_p6 = por %p420_p5, %p419_p4 }
   0xc   :  { %p422_p7 = pnand %p421_p6, %p415_p3 }
   0xe   :  { %425 = shalt.err (!%p422_p7)
}
   0xf   :  { %24 = dma.hbm_to_vmem [thread:$0]  %s551_s1, 128, %s22_s25, [#allocation3]  }
  0x10   :  { %426 = dma.done.wait [#allocation3], 128  }
  0x11   :  { %427 = vsyncadd [#allocation3], 4294967168  ;;  %v429_v0 = vmov 0.0   ;;  %vm430_vm0 = vmmov 0   ;;  %v431_v1 = vmov 0.0|0.0   ;;  %vm47_vm1 = vcmask 64512  }
  0x12   :  { %333 = vmatprep.subr.mxu0 %v429_v0  ;;  %335 = vmatprep.mubr.msk.f32.mxu0 %vm430_vm0, %v429_v0  ;;  %v39_v2 = vld [vmem:[#allocation2] sm:$0xff]  ;;  %v123_v5 = vld [vmem:[%s553_s3 + $0x8] sm:$0xff]  ;;  %v124_v6 = vld [vmem:[%s553_s3 + $0x10] sm:$0xff]  ;;  %vm137_vm2 = vcmask 523264   ;;  %vm300_vm3 = vcmask 31744  }
  0x13   :  { %376 = vmatprep.subr.bf16.mxu1 %v431_v1  ;;  %354 = vmatprep.mubr.msk.f32.mxu1 %vm430_vm0, %v429_v0  ;;  %v38_v3 = vld [vmem:[%s550_s0] sm:$0xff]  ;;  %v125_v7 = vld [vmem:[%s553_s3 + $0x18] sm:$0xff]  ;;  %v127_v11 = vld [vmem:[%s553_s3 + $0x28] sm:$0xff] }
  0x14   :  { %v122_v4 = vld [vmem:[%s553_s3] sm:$0xff]  ;;  %334 = vmatpush3.msra.mxu0 %v39_v2  ;;  %v380_v9 = vpack.c.bf16 %v125_v7, %v124_v6  ;;  %v128_v13 = vld [vmem:[%s553_s3 + $0x30] sm:$0xff]  ;;  %v129_v14 = vld [vmem:[%s553_s3 + $0x38] sm:$0xff] }
  0x15   :  { %336 = vmatmul.mubr.msk.f32.vlgmr.msra.gmra.mrb[0].mxu0 %vm47_vm1, %v38_v3  ;;  %v377_v8 = vpack.c.bf16 %v123_v5, %v122_v4  ;;  %388 = vmatprep.subr.bf16.mxu0 %v431_v1  ;;  %v126_v10 = vld [vmem:[%s553_s3 + $0x20] sm:$0xff]  ;;  %v386_v15 = vpack.c.bf16 %v129_v14, %v128_v13  ;;  %v213_v17 = vld [vmem:[%s555_s5 + $0x8] sm:$0xff]  ;;  %v214_v18 = vld [vmem:[%s555_s5 + $0x10] sm:$0xff] }
  0x16   :  { %373 = vmatprep.mubr.msk.f32.mxu0 %vm430_vm0, %v429_v0  ;;  %v383_v12 = vpack.c.bf16 %v127_v11, %v126_v10  ;;  %v212_v16 = vld [vmem:[%s555_s5] sm:$0xff]  ;;  %v215_v20 = vld [vmem:[%s555_s5 + $0x18] sm:$0xff]  ;;  %v217_v23 = vld [vmem:[%s555_s5 + $0x28] sm:$0xff] }
  0x17   :  { %378 = vmatpush3.bf16.msra.mxu1 %v377_v8  ;;  %v389_v19 = vpack.c.bf16 %v213_v17, %v212_v16  ;;  %v392_v21 = vpack.c.bf16 %v215_v20, %v214_v18  ;;  %v216_v22 = vld [vmem:[%s555_s5 + $0x20] sm:$0xff]  ;;  %v218_v30 = vld [vmem:[%s555_s5 + $0x30] sm:$0xff]  ;;  %v219_v31 = vld [vmem:[%s555_s5 + $0x38] sm:$0xff] }
  0x18   :  { %379 = vmatprep.subr.bf16.mxu1 %v431_v1  ;;  %v395_v24 = vpack.c.bf16 %v217_v23, %v216_v22  ;;  %v307_v25 = vld [vmem:[%s552_s2] ss:$0 sm:$0xff]  ;;  %v398_v32 = vpack.c.bf16 %v219_v31, %v218_v30 }
  0x19   :  { %390 = vmatpush3.bf16.msra.mxu0 %v389_v19  ;;  %v309_v33 = vld [vmem:[%s554_s4] ss:$0 sm:$0xff] }
  0x1a   :  { %391 = vmatprep.subr.bf16.mxu0 %v431_v1  ;;  %v311_v38 = vld [vmem:[%s556_s6] ss:$0 sm:$0xff] }
  0x1b   :  { %381 = vmatpush3.bf16.msra.mxu1 %v380_v9 }
  0x1c   :  { %382 = vmatprep.subr.bf16.mxu1 %v431_v1 }
  0x1d   :  { %393 = vmatpush3.bf16.msra.mxu0 %v392_v21 }
  0x1e   :  { %394 = vmatprep.subr.bf16.mxu0 %v431_v1 }
  0x1f   :  { %384 = vmatpush3.bf16.msra.mxu1 %v383_v12 }
  0x20   :  { %385 = vmatprep.subr.bf16.mxu1 %v431_v1 }
  0x21   :  { %396 = vmatpush3.bf16.msra.mxu0 %v395_v24 }
  0x22   :  { %397 = vmatprep.subr.bf16.mxu0 %v431_v1 }
  0x23   :  { %387 = vmatpush3.bf16.msra.mxu1 %v386_v15 }
  0x25   :  { %399 = vmatpush3.bf16.msra.mxu0 %v398_v32 }
  0xe8   :  { %v117_v26 = vpop.f32.mrb[0].mxu0 }
  0xe9   :  { %v118_v27 = vadd.f32 %v307_v25, %v117_v26  ;;  %v337_v28 = vpop.f32.mrb[1].mxu0 }
  0xeb   :  { %v121_v29 = vmax.f32 %v118_v27, 0.0 }
  0xed   :  { %355 = vmatmul.mubr.msk.f32.vlgmr.msra.gmra.mrb[0].mxu1 %vm137_vm2, %v121_v29 }
 0x1c0   :  { %v207_v34 = vpop.f32.mrb[0].mxu1 }
 0x1c1   :  { %v208_v35 = vadd.f32 %v309_v33, %v207_v34  ;;  %v356_v36 = vpop.f32.mrb[1].mxu1 }
 0x1c3   :  { %v211_v37 = vmax.f32 %v208_v35, 0.0 }
 0x1c5   :  { %374 = vmatmul.mubr.msk.f32.vlgmr.msra.gmra.mrb[2].mxu0 %vm137_vm2, %v211_v37 }
 0x298   :  { %v296_v39 = vpop.f32.mrb[2].mxu0 }
 0x299   :  { %v297_v40 = vadd.f32 %v311_v38, %v296_v39  ;;  %v375_v41 = vpop.f32.mrb[3].mxu0 }
 0x29b   :  { %301 = vst.msk [vmem:[%s557_s7] sm:$0xff] %vm300_vm3, %v297_v40 }
 0x29c   :  { %306 = vsyncpa [#allocation3], 1 }

</bundles_post_ra>
